<compile_context>
chip_gen: v5e
topology: v5e:2x2
jax: 0.10.0
libtpu: 0.0.40
codegen_flags: <defaults>
</compile_context>

<pallas_src>
import jax
import jax.numpy as jnp
from jax import lax
from jax.experimental import pallas as pl
from jax.experimental.pallas import tpu as pltpu

ESP = 1e-12


# ---------------------------------------------------------------------------
# Kernel
# ---------------------------------------------------------------------------
def _make_kernel(hw, tile_p, ragged):
    """Builds the per-tile kernel (static shape params captured by closure)."""

    def kernel(label_ref, res_ref, ratio_ref, l1p_ref):
        # label_ref / res_ref : (bn, C, tile_p) VMEM views
        # ratio_ref           : (bn, 1, tile_p) per-pixel cos(angle)
        # l1p_ref             : (1, 1, 1, 128)  per-step L1 partial (lane-broadcast)
        lab = label_ref[...].astype(jnp.float32)
        res = res_ref[...].astype(jnp.float32)

        # ---- L1 partial: sum over (batch-tile, channels, pixels) of |res-label| ----
        l1_pix = jnp.sum(jnp.abs(res - lab), axis=1, keepdims=True)   # (bn, 1, tp)
        if ragged:
            # The edge pixel-tile reads past H*W; mask those columns out of the sum.
            col = (pl.program_id(1) * tile_p
                   + lax.broadcasted_iota(jnp.int32, l1_pix.shape, 2))
            l1_pix = jnp.where(col < hw, l1_pix, 0.0)
        l1p_ref[...] = jnp.full(l1p_ref.shape, jnp.sum(l1_pix), jnp.float32)

        # ---- SAM cos(angle) per pixel (matches torch: norm -> clamp -> mul -> div) ----
        nom = jnp.sum(lab * res, axis=1, keepdims=True)               # (bn, 1, tp)
        lab_n = jnp.maximum(jnp.sqrt(jnp.sum(lab * lab, axis=1, keepdims=True)), ESP)
        res_n = jnp.maximum(jnp.sqrt(jnp.sum(res * res, axis=1, keepdims=True)), ESP)
        ratio_ref[...] = nom / (lab_n * res_n)
        # Columns past H*W in the edge block may hold garbage/NaN here, but the
        # masked store into the (n, 1, hw) output drops them.

    return kernel


# ---------------------------------------------------------------------------
# Tile planning (bytes-per-step driven, generation-aware VMEM budget)
# ---------------------------------------------------------------------------
def _vmem_capacity_bytes():
    try:
        return int(pltpu.get_tpu_info().vmem_capacity_bytes)
    except Exception:
        return 64 * 1024 * 1024   # conservative fallback: v7x per-TensorCore VMEM


def _round_down_128(x):
    return max(128, (x // 128) * 128)


def _largest_divisor_leq(n, cap):
    cap = max(1, min(n, cap))
    for d in range(cap, 0, -1):
        if n % d == 0:
            return d
    return 1


def _tile_plan(n, c, hw, in_itemsize, work_budget_bytes, dma_target_bytes, min_steps):
    """Pick (bn, tile_p): each grid step should move multi-MiB of input DMA
    while the double-buffered working set fits the chip's VMEM budget."""
    hw_lanes = pl.cdiv(hw, 128) * 128      # pixel extent rounded up to lane width
    c_pad = max(c, 8)                      # sublane padding of the channel dim
    # VMEM bytes per (batch-elem, pixel) column of a block:
    #   2 inputs x 2 pipeline buffers x c_pad x itemsize  +  ratio out: 2 x 8 x 4 B
    bytes_per_col = 2 * 2 * c_pad * in_itemsize + 2 * 8 * 4
    # TODO(synk): tile the channel axis for extreme C where even a (C, 128)
    # column block exceeds the VMEM budget.
    cols_vmem = max(128, work_budget_bytes // bytes_per_col)
    cols_dma = max(128, dma_target_bytes // max(1, 2 * c * in_itemsize))
    cols_balance = max(128, (n * hw_lanes) // min_steps)   # keep >= min_steps steps
    cols = min(cols_vmem, max(cols_dma, 2048), cols_balance)
    cols = _round_down_128(cols)

    tile_p = _round_down_128(min(hw_lanes, cols))
    bn = 1
    if tile_p >= hw_lanes and cols // hw_lanes >= 2:
        # Images are small: add a batch tile to keep per-step DMA in the MiB range.
        bn = _largest_divisor_leq(n, cols // hw_lanes)
    return bn, tile_p


# ---------------------------------------------------------------------------
# Wrapper (equivalent of myloss_spe(N, lamd, mse_lamd).forward(res, label))
# ---------------------------------------------------------------------------
def myloss_spe_pallas(res, label, N, lamd=0.1, mse_lamd=1.0,
                      dma_target_bytes=8 << 20, min_steps=4):
    assert res.shape == label.shape and label.ndim == 4
    n, c, h, w = label.shape
    hw = h * w

    vmem_cap = _vmem_capacity_bytes()
    vmem_limit = int(vmem_cap * 0.75)        # scoped VMEM limit we request
    work_budget = int(vmem_limit * 0.8)      # headroom for compiler scratch etc.

    in_itemsize = jnp.dtype(label.dtype).itemsize
    bn, tile_p = _tile_plan(n, c, hw, in_itemsize, work_budget,
                            dma_target_bytes, min_steps)
    gb = n // bn
    gp = pl.cdiv(hw, tile_p)
    ragged = (hw % tile_p) != 0

    # Free, contiguous NCHW -> (N, C, H*W) view (no HBM transpose pass).
    lab3 = label.reshape(n, c, hw)
    res3 = res.reshape(n, c, hw)

    kernel = _make_kernel(hw, tile_p, ragged)

    ratio, l1part = pl.pallas_call(
        kernel,
        out_shape=(
            jax.ShapeDtypeStruct((n, 1, hw), jnp.float32),        # per-pixel cos(angle)
            jax.ShapeDtypeStruct((gb, gp, 1, 128), jnp.float32),  # per-step L1 partials
        ),
        grid_spec=pltpu.PrefetchScalarGridSpec(
            num_scalar_prefetch=0,
            grid=(gb, gp),
            in_specs=[
                pl.BlockSpec((bn, c, tile_p), lambda b, i: (b, 0, i)),
                pl.BlockSpec((bn, c, tile_p), lambda b, i: (b, 0, i)),
            ],
            out_specs=[
                pl.BlockSpec((bn, 1, tile_p), lambda b, i: (b, 0, i)),
                pl.BlockSpec((1, 1, 1, 128), lambda b, i: (b, i, 0, 0)),
            ],
        ),
        compiler_params=pltpu.CompilerParams(
            # No carried state -> both axes parallel (uses both TCs on v7x).
            dimension_semantics=("parallel", "parallel"),
            vmem_limit_bytes=vmem_limit,
        ),
    )(lab3, res3)

    # ---- glue: final scalar math (matches torch semantics exactly) ----
    l1 = jnp.sum(l1part[:, :, 0, 0]) / (n * c * h * w)   # F.l1_loss(..., mean)
    sam = jnp.arccos(ratio[:, 0, :])                     # NaN where |ratio| > 1
    sam = jnp.where(jnp.isnan(sam), 0.0, sam)            # sam[sam != sam] = 0
    sam_sum = jnp.sum(sam) / (N * h * w)
    # TODO(synk): the original module prints L1/Sam_sum each call; omitted here.
    return mse_lamd * l1 + lamd * sam_sum


# ---------------------------------------------------------------------------
# Pure-JAX reference + self-test
# ---------------------------------------------------------------------------
def _reference_jnp(res, label, N, lamd=0.1, mse_lamd=1.0):
    l1 = jnp.mean(jnp.abs(res - label))
    nom = jnp.sum(label * res, axis=1)
    lab_n = jnp.maximum(jnp.sqrt(jnp.sum(label * label, axis=1)), ESP)
    res_n = jnp.maximum(jnp.sqrt(jnp.sum(res * res, axis=1)), ESP)
    sam = jnp.arccos(nom / (lab_n * res_n))
    sam = jnp.where(jnp.isnan(sam), 0.0, sam)
    h, w = label.shape[2], label.shape[3]
    sam_sum = jnp.sum(sam) / (N * h * w)
    return mse_lamd * l1 + lamd * sam_sum


if __name__ == "__main__":
    key = jax.random.PRNGKey(0)
    k1, k2 = jax.random.split(key)
    n, c, h, w = 2, 4, 16, 16          # small NCHW shapes
    N = n                               # constructor arg N = batch size

    label = jax.random.uniform(k1, (n, c, h, w), dtype=jnp.float32)
    res = label + 0.1 * jax.random.normal(k2, (n, c, h, w), dtype=jnp.float32)

    loss_fn = jax.jit(lambda r, l: myloss_spe_pallas(r, l, N, lamd=0.1, mse_lamd=1.0))
    out = jax.block_until_ready(loss_fn(res, label))

    ref = _reference_jnp(res, label, N, lamd=0.1, mse_lamd=1.0)
    assert jnp.allclose(out, ref, rtol=1e-5, atol=1e-5), (out, ref)

    print("KERNEL_OK")
</pallas_src>

<mosaic_0001>
module attributes {stable_mosaic.version = 11 : i64} {
  func.func @kernel(%arg0: i32, %arg1: i32, %arg2: memref<1x4x128xf32, #tpu.memory_space<vmem>>, %arg3: memref<1x4x128xf32, #tpu.memory_space<vmem>>, %arg4: memref<1x1x128xf32, #tpu.memory_space<vmem>>, %arg5: memref<1x1x1x128xf32, #tpu.memory_space<vmem>>) attributes {dimension_semantics = [#tpu.dimension_semantics<parallel>, #tpu.dimension_semantics<parallel>], iteration_bounds = array<i64: 2, 2>, scalar_prefetch = 0 : i64, scratch_operands = 0 : i64, tpu.core_type = #tpu.core_type<tc>, window_params = [{transform_indices = @transform_0, window_bounds = array<i64: 1, 4, 128>}, {transform_indices = @transform_1, window_bounds = array<i64: 1, 4, 128>}, {transform_indices = @transform_2, window_bounds = array<i64: 1, 1, 128>}, {transform_indices = @transform_3, window_bounds = array<i64: 1, 1, 1, 128>}]} {
    %c0 = arith.constant 0 : index
    %c0_0 = arith.constant 0 : index
    %c0_1 = arith.constant 0 : index
    %0 = vector.load %arg2[%c0, %c0_0, %c0_1] : memref<1x4x128xf32, #tpu.memory_space<vmem>>, vector<1x4x128xf32>
    %c0_2 = arith.constant 0 : index
    %c0_3 = arith.constant 0 : index
    %c0_4 = arith.constant 0 : index
    %1 = vector.load %arg3[%c0_2, %c0_3, %c0_4] : memref<1x4x128xf32, #tpu.memory_space<vmem>>, vector<1x4x128xf32>
    %2 = arith.subf %1, %0 : vector<1x4x128xf32>
    %3 = math.absf %2 : vector<1x4x128xf32>
    %cst = arith.constant dense<0.000000e+00> : vector<1x128xf32>
    %4 = vector.multi_reduction <add>, %3, %cst [1] : vector<1x4x128xf32> to vector<1x128xf32>
    %5 = vector.shape_cast %4 : vector<1x128xf32> to vector<1x1x128xf32>
    %6 = vector.shape_cast %5 : vector<1x1x128xf32> to vector<1x1x1x128xf32>
    %cst_5 = arith.constant dense<0.000000e+00> : vector<1xf32>
    %7 = vector.multi_reduction <add>, %6, %cst_5 [1, 2, 3] : vector<1x1x1x128xf32> to vector<1xf32>
    %8 = vector.shape_cast %7 : vector<1xf32> to vector<1x1x1x1xf32>
    %9 = vector.extract %8[0, 0, 0, 0] : f32 from vector<1x1x1x1xf32>
    %10 = vector.broadcast %9 : f32 to vector<1x1x1x128xf32>
    %c0_6 = arith.constant 0 : index
    %c0_7 = arith.constant 0 : index
    %c0_8 = arith.constant 0 : index
    %c0_9 = arith.constant 0 : index
    %11 = vector.load %arg5[%c0_6, %c0_7, %c0_8, %c0_9] : memref<1x1x1x128xf32, #tpu.memory_space<vmem>>, vector<1x1x1x128xf32>
    tpu.vector_store %arg5[%c0_6, %c0_7, %c0_8, %c0_9], %10 {strides = array<i32>} : memref<1x1x1x128xf32, #tpu.memory_space<vmem>>, vector<1x1x1x128xf32>,
    %12 = arith.mulf %0, %1 : vector<1x4x128xf32>
    %cst_10 = arith.constant dense<0.000000e+00> : vector<1x128xf32>
    %13 = vector.multi_reduction <add>, %12, %cst_10 [1] : vector<1x4x128xf32> to vector<1x128xf32>
    %14 = vector.shape_cast %13 : vector<1x128xf32> to vector<1x1x128xf32>
    %15 = arith.mulf %0, %0 : vector<1x4x128xf32>
    %cst_11 = arith.constant dense<0.000000e+00> : vector<1x128xf32>
    %16 = vector.multi_reduction <add>, %15, %cst_11 [1] : vector<1x4x128xf32> to vector<1x128xf32>
    %17 = vector.shape_cast %16 : vector<1x128xf32> to vector<1x1x128xf32>
    %18 = math.sqrt %17 : vector<1x1x128xf32>
    %cst_12 = arith.constant 9.99999996E-13 : f32
    %19 = vector.broadcast %cst_12 : f32 to vector<1x1x128xf32>
    %20 = arith.maximumf %18, %19 : vector<1x1x128xf32>
    %21 = arith.mulf %1, %1 : vector<1x4x128xf32>
    %cst_13 = arith.constant dense<0.000000e+00> : vector<1x128xf32>
    %22 = vector.multi_reduction <add>, %21, %cst_13 [1] : vector<1x4x128xf32> to vector<1x128xf32>
    %23 = vector.shape_cast %22 : vector<1x128xf32> to vector<1x1x128xf32>
    %24 = math.sqrt %23 : vector<1x1x128xf32>
    %cst_14 = arith.constant 9.99999996E-13 : f32
    %25 = vector.broadcast %cst_14 : f32 to vector<1x1x128xf32>
    %26 = arith.maximumf %24, %25 : vector<1x1x128xf32>
    %27 = arith.mulf %20, %26 : vector<1x1x128xf32>
    %28 = arith.divf %14, %27 : vector<1x1x128xf32>
    %c0_15 = arith.constant 0 : index
    %c0_16 = arith.constant 0 : index
    %c0_17 = arith.constant 0 : index
    %29 = vector.load %arg4[%c0_15, %c0_16, %c0_17] : memref<1x1x128xf32, #tpu.memory_space<vmem>>, vector<1x1x128xf32>
    tpu.vector_store %arg4[%c0_15, %c0_16, %c0_17], %28 {strides = array<i32>} : memref<1x1x128xf32, #tpu.memory_space<vmem>>, vector<1x1x128xf32>,
    return
  }
  func.func @transform_0(%arg0: i32, %arg1: i32) -> (i32, i32, i32) {
    %c0_i32 = arith.constant 0 : i32
    %c0_i32_0 = arith.constant 0 : i32
    return %arg0, %c0_i32, %arg1 : i32, i32, i32
  }
  func.func @transform_1(%arg0: i32, %arg1: i32) -> (i32, i32, i32) {
    %c0_i32 = arith.constant 0 : i32
    %c0_i32_0 = arith.constant 0 : i32
    return %arg0, %c0_i32, %arg1 : i32, i32, i32
  }
  func.func @transform_2(%arg0: i32, %arg1: i32) -> (i32, i32, i32) {
    %c0_i32 = arith.constant 0 : i32
    %c0_i32_0 = arith.constant 0 : i32
    return %arg0, %c0_i32, %arg1 : i32, i32, i32
  }
  func.func @transform_3(%arg0: i32, %arg1: i32) -> (i32, i32, i32, i32) {
    %c0_i32 = arith.constant 0 : i32
    %c0_i32_0 = arith.constant 0 : i32
    %c0_i32_1 = arith.constant 0 : i32
    return %arg0, %arg1, %c0_i32, %c0_i32_0 : i32, i32, i32, i32
  }
}

</mosaic_0001>

<bundles_post_ra>
// kernel: _lambda_.1
= control target key start
LH: loop header
LB: loop body
LE: loop exit
PB: predicated region body
PF: predicated region fallthrough
CT: control target
= control target key end

     0   :  { %s602_s12 = smov 0   ;;  %s604_s13 = smov 0   ;;  %s668_s0 = inlined_call_operand.vmem [shape: f32[2,4,256], index: 0, kind: input, shape index: {}]   ;;  %s669_s1 = inlined_call_operand.vmem [shape: f32[2,4,256], index: 1, kind: input, shape index: {}]   ;;  %s670_s2 = inlined_call_operand.vmem [shape: f32[2,1,256], index: 2, kind: output, shape index: {0}]   ;;  %s671_s3 = inlined_call_operand.vmem [shape: f32[2,2,1,128], index: 3, kind: output, shape index: {1}]  }
   0x1   :  { %s606_s14 = smov 0   ;;  %s608_s15 = smov 0  }
   0x2   :  { %s610_s16 = smov 0  }
   0x3 LB: > { %s23_s17 = sadd.s32 1, %s572_s14  ;;  %s26_s18 = sadd.s32 1, %s576_s15  ;;  %s580_s16 = sphi %s610_s16, %s14_s16   ;;  %s576_s15 = sphi %s608_s15, %s675_s15   ;;  %s572_s14 = sphi %s606_s14, %s674_s14   ;;  %s568_s13 = sphi %s604_s13, %s673_s13   ;;  %s564_s12 = sphi %s602_s12, %s672_s12  }
   0x4   : > { %p24_p0 = scmp.ge.s32.totalorder %s23_s17, 2  ;;  %p485_p1 = scmp.ge.s32.totalorder %s580_s16, 1 }
   0x5   : > { %p176_p2 = scmp.lt.s32.totalorder %s580_s16, 5 }
   0x6   : > { %s677_s17 = smov (%p24_p0, %s23_s17), 0  ;;  %s679_s18 = smov (!%p24_p0, %s26_s18), %s576_s15 }
   0x7   : > { %p177_p3 = pnand %p485_p1, %p176_p2  ;;  %p28_p4 = scmp.ge.s32.totalorder %s679_s18, 2 }
   0x8   : > { %p220_p5 = scmp.lt.s32.totalorder (!%p177_p3), %s568_s13, 1  ;;  %p222_p6 = scmp.lt.s32.totalorder (!%p177_p3), %s564_s12, 1 }
   0x9   : > { %s681_s18 = smov (%p28_p4, %s679_s18), 0  ;;  %180 = sbr.rel (%p177_p3) target bundleno = 219 (0xdb), region = 28 }
   0xe   : > { %s683_s13 = smov (!%p220_p5, %s568_s13), 1  ;;  %s685_s12 = smov (!%p222_p6, %s564_s12), 1  ;;  %vm254_vm0 = vcmask 1043456   ;;  %vm262_vm1 = vcmask 1040384  }
   0xf   : > { %s486_s19 = sshll.u32 %s683_s13, 1 }
  0x10   : > { %s632_s20 = sadd.s32 %s486_s19, %s685_s12 }
  0x11   : > { %s487_s21 = sshll.u32 %s632_s20, 2  ;;  %s242_s30 = scalar_lea.vmem %s670_s2, %s632_s20 }
  0x12   : > { %s227_s24 = scalar_lea.vmem %s668_s0, %s487_s21  ;;  %s235_s27 = scalar_lea.vmem %s669_s1, %s487_s21 }
  0x13   : > { %v250_v0 = vld [vmem:[%s227_s24] sm:$0xf]  ;;  %s249_s6 = scalar_lea.vmem %s671_s3, %s632_s20 }
  0x14   : > { %v251_v1 = vld [vmem:[%s235_s27] sm:$0xf]  ;;  %v283_v3 = vmul.f32 %v250_v0, %v250_v0 }
  0x15   : > { %v252_v2 = vsub.f32 %v251_v1, %v250_v0  ;;  %v304_v8 = vmul.f32 %v251_v1, %v251_v1  ;;  %v275_v36 = vmul.f32 %v251_v1, %v250_v0 }
  0x16   : > { %v284_v5 = vsel %vm254_vm0, %v283_v3, 0.0 }
  0x17   : > { %v253_v4 = vand.u32 2147483647, %v252_v2  ;;  %v285_v6 = vrot.slane %v284_v5, 4  ;;  %v305_v11 = vsel %vm254_vm0, %v304_v8, 0.0  ;;  %v276_v42 = vsel %vm254_vm0, %v275_v36, 0.0 }
  0x18   : > { %v306_v14 = vrot.slane %v305_v11, 4  ;;  %v277_v47 = vrot.slane %v276_v42, 4 }
  0x19   : > { %v255_v7 = vsel %vm254_vm0, %v253_v4, 0.0  ;;  %v286_v10 = vadd.f32 %v285_v6, %v284_v5 }
  0x1a   : > { %v256_v9 = vrot.slane %v255_v7, 4  ;;  %v307_v17 = vadd.f32 %v306_v14, %v305_v11  ;;  %v278_v52 = vadd.f32 %v277_v47, %v276_v42 }
  0x1b   : > { %v287_v13 = vrot.slane %v286_v10, 2 }
  0x1c   : > { %v257_v12 = vadd.f32 %v256_v9, %v255_v7  ;;  %v308_v20 = vrot.slane %v307_v17, 2  ;;  %v279_v55 = vrot.slane %v278_v52, 2 }
  0x1d   : > { %v288_v16 = vadd.f32 %v287_v13, %v286_v10 }
  0x1e   : > { %v258_v15 = vrot.slane %v257_v12, 2  ;;  %v309_v23 = vadd.f32 %v308_v20, %v307_v17  ;;  %v280_v56 = vadd.f32 %v279_v55, %v278_v52 }
  0x1f   : > { %v289_v19 = vrot.slane %v288_v16, 1 }
  0x20   : > { %v259_v18 = vadd.f32 %v258_v15, %v257_v12  ;;  %v310_v25 = vrot.slane %v309_v23, 1  ;;  %v281_v59 = vrot.slane %v280_v56, 1 }
  0x21   : > { %v290_v22 = vadd.f32 %v289_v19, %v288_v16 }
  0x22   : > { %v260_v21 = vrot.slane %v259_v18, 1  ;;  %v311_v27 = vadd.f32 %v310_v25, %v309_v23  ;;  %v282_v1 = vadd.f32 %v281_v59, %v280_v56 }
  0x23   : > { %536 = vrsqrt.f32 %v290_v22  ;;  %vm298_vm2 = vcmp.eq.f32.partialorder %v290_v22, inf  ;;  %v301_v40 = vand.u32 2147483648, %v290_v22  ;;  %vm300_vm3 = vcmp.eq.f32.partialorder %v290_v22, 0.0 }
  0x24   : > { %v261_v24 = vadd.f32 %v260_v21, %v259_v18  ;;  %538 = vrsqrt.f32 %v311_v27  ;;  %vm319_vm4 = vcmp.eq.f32.partialorder %v311_v27, inf  ;;  %v322_v46 = vand.u32 2147483648, %v311_v27 }
  0x25   : > { %vm321_vm5 = vcmp.eq.f32.partialorder %v311_v27, 0.0 }
  0x26   : > { %v263_v26 = vsel %vm262_vm1, %v261_v24, 0.0 }
  0x27   : > { %264 = vadd.xlane.f32.xlu0 %v263_v26 }
  0x29   : > { %v537_v28 = vpop.eup %536 }
  0x2a   : > { %v292_v29 = vmul.f32 %v537_v28, %v290_v22  ;;  %v539_v31 = vpop.eup %538 }
  0x2b   : > { %v313_v33 = vmul.f32 %v539_v31, %v311_v27 }
  0x2c   : > { %v293_v30 = vmul.f32 %v537_v28, %v292_v29 }
  0x2d   : > { %v314_v35 = vmul.f32 %v539_v31, %v313_v33 }
  0x2e   : > { %v294_v32 = vmul.f32 0.5, %v293_v30 }
  0x2f   : > { %v315_v38 = vmul.f32 0.5, %v314_v35 }
  0x30   : > { %v295_v34 = vsub.f32 1.5, %v294_v32 }
  0x31   : > { %v316_v41 = vsub.f32 1.5, %v315_v38 }
  0x32   : > { %v296_v37 = vmul.f32 %v537_v28, %v295_v34 }
  0x33   : > { %v317_v44 = vmul.f32 %v539_v31, %v316_v41 }
  0x34   : > { %v297_v39 = vmul.f32 %v296_v37, %v290_v22 }
  0x35   : > { %v318_v48 = vmul.f32 %v317_v44, %v311_v27 }
  0x36   : > { %v299_v43 = vsel %vm298_vm2, %v290_v22, %v297_v39 }
  0x37   : > { %v302_v45 = vsel %vm300_vm3, %v301_v40, %v299_v43  ;;  %v320_v50 = vsel %vm319_vm4, %v311_v27, %v318_v48 }
  0x38   : > { %v303_v49 = vmax.f32 %v302_v45, 1e-12  ;;  %v323_v51 = vsel %vm321_vm5, %v322_v46, %v320_v50 }
  0x39   : > { %v324_v53 = vmax.f32 %v323_v51, 1e-12 }
  0x3b   : > { %v325_v54 = vmul.f32 %v324_v53, %v303_v49 }
  0x3d   : > { %540 = vrcp.f32 %v325_v54  ;;  %v337_v60 = vand.u32 2147483648, %v325_v54  ;;  %vm331_vm6 = vweird.f32 %v325_v54  ;;  %v335_v62 = vand.u32 2147483647, %v325_v54 }
  0x3f   : > { %v338_v0 = vor.u32 1.1754944e-38, %v337_v60  ;;  %vm336_vm9 = vcmp.eq.f32.partialorder %v335_v62, 8.507059e+37 }
  0x43   : > { %v541_v57 = vpop.eup %540 }
  0x44   : > { %v327_v58 = vmul.f32 %v541_v57, %v325_v54  ;;  %vm332_vm7 = vweird.f32 %v541_v57 }
  0x45   : > { %vm333_vm8 = vmor %vm331_vm6, %vm332_vm7 }
  0x46   : > { %v328_v61 = vsub.f32 1.0, %v327_v58 }
  0x48   : > { %v329_v63 = vmul.f32 %v541_v57, %v328_v61 }
  0x4a   : > { %v330_v2 = vadd.f32 %v541_v57, %v329_v63 }
  0x4c   : > { %v334_v3 = vsel %vm333_vm8, %v541_v57, %v330_v2 }
  0x4d   : > { %v339_v4 = vsel %vm336_vm9, %v338_v0, %v334_v3 }
  0x4e   : > { %v340_v5 = vmul.f32 %v339_v4, %v282_v1 }
  0x50   : > { %341 = vst [vmem:[%s242_s30] sm:$0x1] %v340_v5 }
  0x9a   : > { %v265_v6 = vpop.xlane.xlu0 %264 }
  0x9b   : > { %v266_v7 = vrot.slane %v265_v6, 4 }
  0x9d   : > { %v267_v8 = vadd.f32 %v266_v7, %v265_v6 }
  0x9f   : > { %v268_v9 = vrot.slane %v267_v8, 2 }
  0xa1   : > { %v269_v10 = vadd.f32 %v268_v9, %v267_v8 }
  0xa3   : > { %v270_v11 = vrot.slane %v269_v10, 1 }
  0xa5   : > { %v271_v12 = vadd.f32 %v270_v11, %v269_v10 }
  0xa7   : > { %494 = vpush %v271_v12 }
  0xd8   : > { %s495_s7 = spop %494 }
  0xd9   : > { %v273_v13 = vstv %s495_s7 }
  0xda   : > { %274 = vst [vmem:[%s249_s6] sm:$0x1] %v273_v13 }
  0xdb PF: > { %s14_s16 = sadd.s32 1, %s580_s16   ;;  %s672_s12 = smov %s572_s14 }
  0xdc   : > { %p11_p7 = scmp.ge.s32.totalorder %s14_s16, 6   ;;  %s673_s13 = smov %s576_s15 }
  0xdd   : > { %s674_s14 = smov %s677_s17  ;;  %s675_s15 = smov %s681_s18 }
  0xde   :  { %13 = sbr.rel (!%p11_p7) target bundleno = 3 (0x3), region = 73 }

</bundles_post_ra>
